<compile_context>
chip_gen: v6e
topology: v6e:2x2x1
jax: 0.10.0
libtpu: 0.0.40
codegen_flags: <defaults>
</compile_context>

<pallas_src>
import math
from functools import partial

import jax
import jax.numpy as jnp
from jax.experimental import pallas as pl
from jax.experimental.pallas import tpu as pltpu


# ----------------------------- small helpers ------------------------------ #

def _round_up(a, b):
    return (a + b - 1) // b * b


def _cdiv(a, b):
    return (a + b - 1) // b


def _sublane(dtype):
    # Minimal sublane pack for the dtype: 8 (f32), 16 (bf16), 32 (int8/fp8).
    return max(8, 32 // jnp.dtype(dtype).itemsize)


def _largest_divisor_tile(total, unit, target):
    """Largest multiple of `unit` that divides `total` and is <= max(target, unit)."""
    m = total // unit
    cap = max(1, min(m, target // unit))
    for g in range(cap, 0, -1):
        if m % g == 0:
            return g * unit
    return unit


def _gelu(x, approximate):
    if approximate:
        # tanh form -> transcendental goes to the EUP slot (frees the VALU).
        return jax.nn.gelu(x, approximate=True)
    # nn.GELU() default is the exact erf-based GELU (kept for PyTorch parity).
    return 0.5 * x * (1.0 + jax.lax.erf(x * (1.0 / math.sqrt(2.0))))


# -------------------------------- kernels ---------------------------------- #

def _ffn_fused_kernel(x_ref, w1_ref, b1_ref, w2_ref, b2_ref, o_ref, *,
                      approximate_gelu):
    # Weights-resident path: both matmuls in one body, no accumulator RMW.
    h = jnp.dot(x_ref[...], w1_ref[...], preferred_element_type=jnp.float32)
    h = _gelu(h + b1_ref[...].astype(jnp.float32), approximate_gelu)
    acc = jnp.dot(h.astype(w2_ref.dtype), w2_ref[...],
                  preferred_element_type=jnp.float32)
    o_ref[...] = (acc + b2_ref[...].astype(jnp.float32)).astype(o_ref.dtype)
    # TODO(synk): dropout is identity (eval mode); training-mode RNG mask not implemented.


def _ffn_tiled_kernel(x_ref, w1_ref, b1_ref, w2_ref, b2_ref, o_ref, acc_ref, *,
                      approximate_gelu):
    # x_ref : (tile_n, d_p)   w1_ref: (d_p, tile_f)   b1_ref: (1, tile_f)
    # w2_ref: (tile_f, d_p)   b2_ref: (1, d_p)        acc_ref: (tile_n, d_p) f32
    k = pl.program_id(1)

    @pl.when(k == 0)
    def _():
        acc_ref[...] = jnp.zeros_like(acc_ref)

    h = jnp.dot(x_ref[...], w1_ref[...], preferred_element_type=jnp.float32)
    h = _gelu(h + b1_ref[...].astype(jnp.float32), approximate_gelu)
    acc_ref[...] += jnp.dot(h.astype(w2_ref.dtype), w2_ref[...],
                            preferred_element_type=jnp.float32)

    @pl.when(k == pl.num_programs(1) - 1)
    def _():
        o_ref[...] = (acc_ref[...] + b2_ref[...].astype(jnp.float32)).astype(o_ref.dtype)


# ------------------------------ host wrapper ------------------------------- #

def pad_ffn_params(w1, b1, w2, b2):
    """Pad weights/biases to lane-aligned (128-multiple) shapes ONCE at init.

    Zero padding is exact for this FFN: gelu(0) = 0 and padded w2 rows are 0.
    """
    d_model, ff_dim = w1.shape
    d_p, f_p = _round_up(d_model, 128), _round_up(ff_dim, 128)
    w1p = jnp.pad(w1, ((0, d_p - d_model), (0, f_p - ff_dim)))
    b1p = jnp.pad(jnp.reshape(b1, (1, ff_dim)), ((0, 0), (0, f_p - ff_dim)))
    w2p = jnp.pad(w2, ((0, f_p - ff_dim), (0, d_p - d_model)))
    b2p = jnp.pad(jnp.reshape(b2, (1, d_model)), ((0, 0), (0, d_p - d_model)))
    return w1p, b1p, w2p, b2p


def feed_forward(x, w1, b1, w2, b2, *, approximate_gelu=False,
                 target_tile_n=512, target_tile_f=1024, force_path=None):
    """x: (..., d_model) -> (..., d_model). All compute inside the Pallas kernel.

    Pass weights produced by pad_ffn_params() to avoid per-call weight padding.
    """
    d_model = x.shape[-1]
    lead = x.shape[:-1]
    n = math.prod(lead) if lead else 1
    out_dtype = x.dtype
    d_p = _round_up(d_model, 128)

    if w1.shape[0] not in (d_model, d_p):
        raise ValueError("w1 must be (d_model, ff_dim) or pre-padded via pad_ffn_params")

    # Fallback per-call padding only if the caller did not pre-pad.
    if w1.shape[0] != d_p or (w1.shape[1] % 128) != 0:
        w1, b1, w2, b2 = pad_ffn_params(w1, b1, w2, b2)
    f_p = w1.shape[1]
    b1 = jnp.reshape(b1, (1, f_p))
    b2 = jnp.reshape(b2, (1, d_p))

    x_itemsize = jnp.dtype(x.dtype).itemsize
    w_itemsize = jnp.dtype(w1.dtype).itemsize
    o_itemsize = jnp.dtype(out_dtype).itemsize
    b_itemsize = jnp.dtype(b1.dtype).itemsize

    # Per-chip VMEM budget (v5e/v6e: 128 MiB physical, v7x: 64 MiB).
    try:
        vmem_cap = int(pltpu.get_tpu_info().vmem_capacity_bytes)
    except Exception:
        vmem_cap = 64 * 1024 * 1024  # conservative (v7x-sized) fallback
    budget = min(int(vmem_cap * 0.70), 96 * 1024 * 1024)
    vmem_limit = min(int(vmem_cap * 0.85), 100 * 1024 * 1024)

    # Row tiling: adaptive (minimize padding waste), rounded to the dtype's
    # sublane pack; at least 2 row tiles so v7x's two TensorCores both work.
    sub = _sublane(x.dtype)
    n_sub = _round_up(n, sub)
    n_tiles = max(1, _cdiv(n_sub, target_tile_n))
    if n_tiles == 1 and n_sub > sub:
        n_tiles = 2
    tile_n = _round_up(_cdiv(n_sub, n_tiles), sub)

    weight_bytes = (w1.size + w2.size) * w_itemsize + (b1.size + b2.size) * b_itemsize

    def fast_bytes(tn):
        # 2x weights (double-buffer worst case) + per-row-tile activation slabs.
        return (2 * weight_bytes
                + 2 * tn * d_p * x_itemsize        # x tile (double-buffered)
                + 2 * tn * d_p * o_itemsize        # out tile
                + tn * f_p * (4 + w_itemsize)      # f32 hidden + cast copy
                + tn * d_p * 4)                    # f32 result before cast

    use_fast = force_path != "tiled"
    if use_fast and force_path != "fast":
        use_fast = 2 * weight_bytes <= budget // 2
    if use_fast:
        tn = tile_n
        while tn > sub and fast_bytes(tn) > budget:
            tn = _round_up(tn // 2, sub)
        if fast_bytes(tn) <= budget or force_path == "fast":
            tile_n = tn
        else:
            use_fast = False

    tile_f = f_p
    if not use_fast:
        tile_f = _largest_divisor_tile(f_p, 128, target_tile_f)

        def tiled_bytes(tn, tf):
            return (2 * tn * d_p * x_itemsize          # x tile
                    + 2 * d_p * tf * w_itemsize        # w1 tile
                    + 2 * tf * d_p * w_itemsize        # w2 tile
                    + 2 * (tf + d_p) * b_itemsize      # bias tiles
                    + 2 * tn * d_p * o_itemsize        # out tile
                    + tn * d_p * 4                     # f32 accumulator scratch
                    + tn * tf * (4 + w_itemsize))      # f32 hidden + cast copy

        while tile_f > 128 and tiled_bytes(tile_n, tile_f) > budget:
            tile_f = _largest_divisor_tile(f_p, 128, tile_f - 128)
        while tile_n > sub and tiled_bytes(tile_n, tile_f) > budget:
            tile_n = _round_up(tile_n // 2, sub)

    n_p = _round_up(n_sub, tile_n)

    # Per-call padding of the activations only (weights are already padded).
    x2 = jnp.pad(x.reshape(n, d_model), ((0, n_p - n), (0, d_p - d_model)))

    cost = pl.CostEstimate(
        flops=4 * n_p * d_p * f_p,          # two matmuls, 2 flops / MAC
        transcendentals=n_p * f_p,
        bytes_accessed=(x2.size * x_itemsize
                        + (w1.size + w2.size) * w_itemsize
                        + (b1.size + b2.size) * b_itemsize
                        + n_p * d_p * o_itemsize),
    )

    if use_fast:
        kernel = partial(_ffn_fused_kernel, approximate_gelu=approximate_gelu)
        grid = (n_p // tile_n,)
        in_specs = [
            pl.BlockSpec((tile_n, d_p), lambda i: (i, 0)),   # x row tile
            pl.BlockSpec((d_p, f_p), lambda i: (0, 0)),      # w1 (resident)
            pl.BlockSpec((1, f_p), lambda i: (0, 0)),         # b1
            pl.BlockSpec((f_p, d_p), lambda i: (0, 0)),       # w2 (resident)
            pl.BlockSpec((1, d_p), lambda i: (0, 0)),          # b2
        ]
        out_specs = pl.BlockSpec((tile_n, d_p), lambda i: (i, 0))
        scratch_shapes = []
        dims = ("parallel",)
    else:
        kernel = partial(_ffn_tiled_kernel, approximate_gelu=approximate_gelu)
        grid = (n_p // tile_n, f_p // tile_f)
        in_specs = [
            pl.BlockSpec((tile_n, d_p), lambda i, k: (i, 0)),  # x rows
            pl.BlockSpec((d_p, tile_f), lambda i, k: (0, k)),  # w1 ff-tile
            pl.BlockSpec((1, tile_f), lambda i, k: (0, k)),    # b1 ff-tile
            pl.BlockSpec((tile_f, d_p), lambda i, k: (k, 0)),  # w2 ff-tile
            pl.BlockSpec((1, d_p), lambda i, k: (0, 0)),       # b2
        ]
        out_specs = pl.BlockSpec((tile_n, d_p), lambda i, k: (i, 0))
        scratch_shapes = [pltpu.VMEM((tile_n, d_p), jnp.float32)]
        dims = ("parallel", "arbitrary")

    out2 = pl.pallas_call(
        kernel,
        out_shape=jax.ShapeDtypeStruct((n_p, d_p), out_dtype),
        grid_spec=pltpu.PrefetchScalarGridSpec(
            num_scalar_prefetch=0,
            grid=grid,
            in_specs=in_specs,
            out_specs=out_specs,
            scratch_shapes=scratch_shapes,
        ),
        compiler_params=pltpu.CompilerParams(
            dimension_semantics=dims,
            vmem_limit_bytes=vmem_limit,
        ),
        cost_estimate=cost,
    )(x2, w1, b1, w2, b2)

    out2 = out2[:n, :d_model]
    return out2.reshape(*lead, d_model)


def init_params(key, d_model, ff_dim, dtype=jnp.float32):
    """Deterministic init matching nn.Linear shapes (weights stored transposed)."""
    k1, k2, k3, k4 = jax.random.split(key, 4)
    bound1 = 1.0 / math.sqrt(d_model)
    bound2 = 1.0 / math.sqrt(ff_dim)
    # PyTorch Linear weight is (out, in); we keep (in, out) for x @ W.
    w1 = jax.random.uniform(k1, (d_model, ff_dim), dtype, -bound1, bound1)
    b1 = jax.random.uniform(k2, (1, ff_dim), dtype, -bound1, bound1)
    w2 = jax.random.uniform(k3, (ff_dim, d_model), dtype, -bound2, bound2)
    b2 = jax.random.uniform(k4, (1, d_model), dtype, -bound2, bound2)
    return w1, b1, w2, b2


if __name__ == "__main__":
    key = jax.random.PRNGKey(0)
    batch, seq, d_model, ff_dim = 2, 8, 32, 64

    kx, kp = jax.random.split(key)
    x = jax.random.normal(kx, (batch, seq, d_model), jnp.float32)
    w1, b1, w2, b2 = init_params(kp, d_model, ff_dim)

    # Pad weights ONCE (hoisted out of the per-call path).
    w1p, b1p, w2p, b2p = pad_ffn_params(w1, b1, w2, b2)

    # Plain-JAX reference (eval-mode dropout = identity).
    h_ref = _gelu(x.reshape(-1, d_model) @ w1 + b1, False)
    ref = (h_ref @ w2 + b2).reshape(batch, seq, d_model)

    # 1) Weights-resident fast path (default for small models).
    out_fast = jax.block_until_ready(feed_forward(x, w1p, b1p, w2p, b2p))
    assert out_fast.shape == (batch, seq, d_model)
    assert jnp.allclose(out_fast, ref, atol=1e-5, rtol=1e-5)

    # 2) Tiled ff-reduction path (forced), exercising the f32 accumulator grid.
    out_tiled = jax.block_until_ready(
        feed_forward(x, w1p, b1p, w2p, b2p, force_path="tiled"))
    assert jnp.allclose(out_tiled, ref, atol=1e-5, rtol=1e-5)

    # 3) Raw (unpadded) weights still work via the in-call padding fallback.
    out_raw = jax.block_until_ready(feed_forward(x, w1, b1, w2, b2))
    assert jnp.allclose(out_raw, ref, atol=1e-5, rtol=1e-5)

    # 4) bf16 operands (MXU bf16-in / f32-acc path); loose tolerance vs f32 ref.
    xb = x.astype(jnp.bfloat16)
    pb = pad_ffn_params(*(p.astype(jnp.bfloat16) for p in (w1, b1, w2, b2)))
    out_bf16 = jax.block_until_ready(feed_forward(xb, *pb))
    assert jnp.allclose(out_bf16.astype(jnp.float32), ref, atol=0.15, rtol=0.1)

    print("KERNEL_OK")
</pallas_src>

<mosaic_0001>
module attributes {stable_mosaic.version = 11 : i64} {
  func.func @_ffn_fused_kernel(%arg0: i32, %arg1: memref<8x128xf32, #tpu.memory_space<vmem>>, %arg2: memref<128x128xf32, #tpu.memory_space<vmem>>, %arg3: memref<1x128xf32, #tpu.memory_space<vmem>>, %arg4: memref<128x128xf32, #tpu.memory_space<vmem>>, %arg5: memref<1x128xf32, #tpu.memory_space<vmem>>, %arg6: memref<8x128xf32, #tpu.memory_space<vmem>>) attributes {dimension_semantics = [#tpu.dimension_semantics<parallel>], iteration_bounds = array<i64: 2>, scalar_prefetch = 0 : i64, scratch_operands = 0 : i64, tpu.core_type = #tpu.core_type<tc>, window_params = [{transform_indices = @transform_0, window_bounds = array<i64: 8, 128>}, {pipeline_mode = #tpu.pipeline_mode<synchronous>, transform_indices = @transform_1, window_bounds = array<i64: 128, 128>}, {pipeline_mode = #tpu.pipeline_mode<synchronous>, transform_indices = @transform_2, window_bounds = array<i64: 1, 128>}, {pipeline_mode = #tpu.pipeline_mode<synchronous>, transform_indices = @transform_3, window_bounds = array<i64: 128, 128>}, {pipeline_mode = #tpu.pipeline_mode<synchronous>, transform_indices = @transform_4, window_bounds = array<i64: 1, 128>}, {transform_indices = @transform_5, window_bounds = array<i64: 8, 128>}]} {
    %c0 = arith.constant 0 : index
    %c0_0 = arith.constant 0 : index
    %0 = vector.load %arg1[%c0, %c0_0] : memref<8x128xf32, #tpu.memory_space<vmem>>, vector<8x128xf32>
    %c0_1 = arith.constant 0 : index
    %c0_2 = arith.constant 0 : index
    %1 = vector.load %arg2[%c0_1, %c0_2] : memref<128x128xf32, #tpu.memory_space<vmem>>, vector<128x128xf32>
    %cst = arith.constant dense<0.000000e+00> : vector<8x128xf32>
    %2 = tpu.matmul %0, %1, %cst {dimension_numbers = #tpu.dot_dimension_numbers<[1], [0], [0], [1], [0, 0, 1, 1], [], []>} : vector<8x128xf32>, vector<128x128xf32>, vector<8x128xf32> -> vector<8x128xf32>
    %c0_3 = arith.constant 0 : index
    %c0_4 = arith.constant 0 : index
    %3 = vector.load %arg3[%c0_3, %c0_4] : memref<1x128xf32, #tpu.memory_space<vmem>>, vector<1x128xf32>
    %4 = vector.broadcast %3 : vector<1x128xf32> to vector<8x128xf32>
    %5 = arith.addf %2, %4 : vector<8x128xf32>
    %cst_5 = arith.constant 5.000000e-01 : f32
    %6 = vector.broadcast %cst_5 : f32 to vector<8x128xf32>
    %7 = arith.mulf %6, %5 : vector<8x128xf32>
    %cst_6 = arith.constant 0.707106769 : f32
    %8 = vector.broadcast %cst_6 : f32 to vector<8x128xf32>
    %9 = arith.mulf %5, %8 : vector<8x128xf32>
    %10 = math.erf %9 : vector<8x128xf32>
    %cst_7 = arith.constant 1.000000e+00 : f32
    %11 = vector.broadcast %cst_7 : f32 to vector<8x128xf32>
    %12 = arith.addf %11, %10 : vector<8x128xf32>
    %13 = arith.mulf %7, %12 : vector<8x128xf32>
    %c0_8 = arith.constant 0 : index
    %c0_9 = arith.constant 0 : index
    %14 = vector.load %arg4[%c0_8, %c0_9] : memref<128x128xf32, #tpu.memory_space<vmem>>, vector<128x128xf32>
    %cst_10 = arith.constant dense<0.000000e+00> : vector<8x128xf32>
    %15 = tpu.matmul %13, %14, %cst_10 {dimension_numbers = #tpu.dot_dimension_numbers<[1], [0], [0], [1], [0, 0, 1, 1], [], []>} : vector<8x128xf32>, vector<128x128xf32>, vector<8x128xf32> -> vector<8x128xf32>
    %c0_11 = arith.constant 0 : index
    %c0_12 = arith.constant 0 : index
    %16 = vector.load %arg5[%c0_11, %c0_12] : memref<1x128xf32, #tpu.memory_space<vmem>>, vector<1x128xf32>
    %17 = vector.broadcast %16 : vector<1x128xf32> to vector<8x128xf32>
    %18 = arith.addf %15, %17 : vector<8x128xf32>
    %c0_13 = arith.constant 0 : index
    %c0_14 = arith.constant 0 : index
    %19 = vector.load %arg6[%c0_13, %c0_14] : memref<8x128xf32, #tpu.memory_space<vmem>>, vector<8x128xf32>
    tpu.vector_store %arg6[%c0_13, %c0_14], %18 {strides = array<i32>} : memref<8x128xf32, #tpu.memory_space<vmem>>, vector<8x128xf32>,
    return
  }
  func.func @transform_0(%arg0: i32) -> (i32, i32) {
    %c0_i32 = arith.constant 0 : i32
    %c0_i32_0 = arith.constant 0 : i32
    return %arg0, %c0_i32 : i32, i32
  }
  func.func @transform_1(%arg0: i32) -> (i32, i32) {
    %c0_i32 = arith.constant 0 : i32
    %c0_i32_0 = arith.constant 0 : i32
    %c0_i32_1 = arith.constant 0 : i32
    return %c0_i32, %c0_i32_0 : i32, i32
  }
  func.func @transform_2(%arg0: i32) -> (i32, i32) {
    %c0_i32 = arith.constant 0 : i32
    %c0_i32_0 = arith.constant 0 : i32
    %c0_i32_1 = arith.constant 0 : i32
    return %c0_i32, %c0_i32_0 : i32, i32
  }
  func.func @transform_3(%arg0: i32) -> (i32, i32) {
    %c0_i32 = arith.constant 0 : i32
    %c0_i32_0 = arith.constant 0 : i32
    %c0_i32_1 = arith.constant 0 : i32
    return %c0_i32, %c0_i32_0 : i32, i32
  }
  func.func @transform_4(%arg0: i32) -> (i32, i32) {
    %c0_i32 = arith.constant 0 : i32
    %c0_i32_0 = arith.constant 0 : i32
    %c0_i32_1 = arith.constant 0 : i32
    return %c0_i32, %c0_i32_0 : i32, i32
  }
  func.func @transform_5(%arg0: i32) -> (i32, i32) {
    %c0_i32 = arith.constant 0 : i32
    %c0_i32_0 = arith.constant 0 : i32
    return %arg0, %c0_i32 : i32, i32
  }
}

</mosaic_0001>

<bundles_post_ra>
// kernel: tpu_custom_call.1
= control target key start
LH: loop header
LB: loop body
LE: loop exit
PB: predicated region body
PF: predicated region fallthrough
CT: control target
= control target key end

     0   :  { %10 = vsyncpa [#allocation3], 0  ;;  %s1166_s0 = inlined_call_operand.hbm [shape: f32[16,128], index: 0, kind: input, shape index: {}]   ;;  %s1167_s1 = inlined_call_operand.hbm [shape: f32[128,128], index: 1, kind: input, shape index: {}]   ;;  %s1168_s2 = inlined_call_operand.vmem [shape: f32[1,128], index: 2, kind: input, shape index: {}]   ;;  %s1169_s3 = inlined_call_operand.hbm [shape: f32[128,128], index: 3, kind: input, shape index: {}]   ;;  %s1170_s4 = inlined_call_operand.vmem [shape: f32[1,128], index: 4, kind: input, shape index: {}]   ;;  %s1171_s5 = inlined_call_operand.hbm [shape: f32[16,128], index: 5, kind: output, shape index: {}]  }
   0x1   :  { %12 = vsyncpa [#allocation3 + $0x1], 0 }
   0x2   :  { %13 = vsyncpa [#allocation6], 0 }
   0x3   :  { %14 = vsyncpa [#allocation4], 0 }
   0x4   :  { %16 = vsyncpa [#allocation4 + $0x1], 0  ;;  %s948_s18 = smov 0   ;;  %s950_s19 = smov 0  }
   0x5   :  { %s952_s20 = smov 0   ;;  %s954_s21 = smov 0  }
   0x6 LB: > { %s969_s22 = sadd.s32 4294967295, %s908_s21   ;;  %s565_s23 = sadd.s32 4294967294, %s908_s21   ;;  %s908_s21 = sphi %s954_s21, %s1193_s21   ;;  %s904_s20 = sphi %s952_s20, %s1192_s20   ;;  %s900_s19 = sphi %s950_s19, %s1191_s19   ;;  %s896_s18 = sphi %s948_s18, %s1190_s18  }
   0x7   : > { %p42_p0 = scmp.ne.s32.totalorder %s900_s19, %s896_s18  ;;  %p1172_p1 = scmp.eq.s32.totalorder %s969_s22, 0 }
   0x8   : > { %p156_p3 = scmp.eq.s32.totalorder %s565_s23, 1  ;;  %p566_p5 = scmp.ge.s32.totalorder %s908_s21, 1 }
   0x9   : > { %p978_p4 = por %p1172_p1, %p42_p0  ;;  %p163_p7 = scmp.lt.s32.totalorder %s908_s21, 3 }
   0xa   : > { %p983_p6 = por %p156_p3, %p42_p0  ;;  %s910_s27 = smov [#allocation5]  }
   0xb   : > { %s1176_s24 = scalar_select %p978_p4, 1, 0 }
   0xc   : > { %s1177_s25 = scalar_select %p983_p6, 1, 0 }
   0xd   : > { %p988_p8 = pnand %p566_p5, %p163_p7  ;;  %s175_s28 = sshll.u32 %s910_s27, 4  ;;  %s176_s28 = int_to_ptr.vmem [resolvable:$true] %s175_s28 }
   0xe   : > { %s911_s30 = smov [#allocation7]   ;;  %s771_s7 = scalar_lea.vmem %s176_s28, 2048 }
   0xf   : > { %s1178_s26 = scalar_select %p988_p8, 1, 0 }
  0x10   : > { %p699_p9 = pneg %p988_p8  ;;  %s191_s6 = sshll.u32 %s911_s30, 4  ;;  %s192_s6 = int_to_ptr.vmem [resolvable:$true] %s191_s6 }
  0x11   : > { %p772_p13 = scmp.ne.s32.totalorder %s176_s28, %s771_s7  ;;  %p779_p5 = scmp.lt.s32.totalorder %s176_s28, %s176_s28 }
  0x12   : > { %p997_p11 = pnand %p699_p9, %p1172_p1  ;;  %p780_p7 = scmp.lt.s32.totalorder %s771_s7, %s771_s7 }
  0x14   : > { %p762_p12 = pneg %p997_p11  ;;  %p781_p10 = por %p780_p7, %p779_p5 }
  0x16   : > { %p774_p0 = pnand %p772_p13, %p762_p12 }
  0x18   : > { %p775_p3 = pneg %p774_p0 }
  0x1a   : > { %p782_p9 = pnand %p781_p10, %p775_p3 }
  0x1c   : > { %785 = shalt.err (!%p782_p9)
}
  0x1d   : > { %s912_s8 = smov 128   ;;  %s913_s9 = smov 8  }
  0x1e   : > { %702 = dma.hbm_to_vmem [thread:$0]  (!%p997_p11), %s1167_s1, 2048, %s176_s28, [#allocation6], %s912_s8, %s912_s8, %s913_s9  }
  0x1f   : > { %s797_s12 = scalar_lea.vmem %s192_s6, 2048  ;;  %p805_p2 = scmp.lt.s32.totalorder %s192_s6, %s192_s6 }
  0x20   : > { %p798_p1 = scmp.ne.s32.totalorder %s192_s6, %s797_s12  ;;  %p806_p6 = scmp.lt.s32.totalorder %s797_s12, %s797_s12 }
  0x22   : > { %p800_p13 = pnand %p798_p1, %p762_p12  ;;  %p807_p5 = por %p806_p6, %p805_p2 }
  0x24   : > { %p801_p0 = pneg %p800_p13 }
  0x26   : > { %p808_p10 = pnand %p807_p5, %p801_p0 }
  0x28   : > { %811 = shalt.err (!%p808_p10)
}
  0x29   : > { %705 = dma.hbm_to_vmem [thread:$0]  (!%p997_p11), %s1169_s3, 2048, %s192_s6, [#allocation6], %s912_s8, %s912_s8, %s913_s9  }
  0x2a   : > { %s1020_s15 = sadd.s32 1, %s908_s21   ;;  %s29_s16 = sadd.s32 1, %s904_s20 }
  0x2b   : > { %s26_s17 = ssub.s32 %s908_s21, %s1020_s15  ;;  %p36_p1 = scmp.ne.s32.totalorder %s904_s20, %s900_s19 }
  0x2c   : > { %p27_p2 = scmp.eq.s32.totalorder %s26_s17, 0  ;;  %p37_p6 = scmp.eq.s32.totalorder %s908_s21, 0 }
  0x2d   : > { %p1180_p12 = scmp.eq.s32.totalorder %s969_s22, 1  ;;  %p716_p7 = scmp.lt.s32.totalorder %s908_s21, 2 }
  0x2e   : > { %s1036_s27 = scalar_select %p27_p2, %s904_s20, %s29_s16  }
  0x2f   : > { %p1030_p3 = por %p1180_p12, %p36_p1  ;;  %p38_p9 = por %p37_p6, %p36_p1 }
  0x30   : > { %s208_s28 = sand.u32 1, %s904_s20   ;;  %s571_s30 = sshll.u32 %s908_s21, 7 }
  0x31   : > { %s1181_s23 = scalar_select %p1030_p3, 1, 0 }
  0x32   : > { %s570_s29 = sshll.u32 %s208_s28, 3  ;;  %s1043_s8 = scalar_lea.hbm %s1166_s0, %s571_s30 }
  0x33   : > { %s212_s9 = scalar_lea.vmem [#allocation2], %s570_s29  ;;  %p1045_p11 = pnand %p716_p7, %p38_p9 }
  0x34   : > { %s219_s10 = sshll.u32 %s212_s9, 4  ;;  %s209_s12 = scalar_lea.sflag [#allocation3], %s208_s28  ;;  %s220_s10 = int_to_ptr.vmem [resolvable:$true] %s219_s10 }
  0x35   : > { %s812_s13 = scalar_lea.hbm %s1043_s8, 128  ;;  %p814_p0 = pneg %p1045_p11 }
  0x36   : > { %p813_p13 = scmp.ne.s32.totalorder %s1043_s8, %s812_s13  ;;  %s817_s17 = scalar_lea.hbm %s1166_s0, 256 }
  0x37   : > { %p818_p1 = scmp.lt.s32.totalorder %s1043_s8, %s1166_s0  ;;  %p819_p2 = scmp.lt.s32.totalorder %s817_s17, %s812_s13 }
  0x38   : > { %p815_p5 = pnand %p814_p0, %p813_p13 }
  0x39   : > { %p820_p6 = por %p819_p2, %p818_p1 }
  0x3a   : > { %p816_p10 = pneg %p815_p5 }
  0x3c   : > { %p821_p12 = pnand %p820_p6, %p816_p10 }
  0x3e   : > { %824 = shalt.err (!%p821_p12)
}
  0x3f   : > { %s825_s6 = scalar_lea.vmem %s220_s10, 128  ;;  %s914_s28 = smov [#allocation2]  }
  0x40   : > { %p826_p7 = scmp.ne.s32.totalorder %s220_s10, %s825_s6  ;;  %s830_s7 = sshll.u32 %s914_s28, 4  ;;  %s831_s7 = int_to_ptr.vmem [resolvable:$false] %s830_s7 }
  0x41   : > { %s832_s9 = scalar_lea.vmem %s831_s7, 256  ;;  %p833_p13 = scmp.lt.s32.totalorder %s220_s10, %s831_s7 }
  0x42   : > { %p828_p9 = pnand %p826_p7, %p814_p0  ;;  %p834_p5 = scmp.lt.s32.totalorder %s832_s9, %s825_s6 }
  0x44   : > { %p829_p3 = pneg %p828_p9  ;;  %p835_p4 = por %p834_p5, %p833_p13 }
  0x46   : > { %p836_p8 = pnand %p835_p4, %p829_p3 }
  0x48   : > { %839 = shalt.err (!%p836_p8)
}
  0x49   : > { %709 = dma.hbm_to_vmem [thread:$0]  (!%p1045_p11), %s1043_s8, 128, %s220_s10, %s209_s12  }
  0x4a   : > { %p1183_p10 = scmp.ne.s32.totalorder %s1178_s26, 0 }
  0x4b   : > { %s1066_s13 = sand.u32 (!%p1183_p10), 1, %s900_s19   ;;  %p1184_p4 = scmp.ne.s32.totalorder (!%p1183_p10), %s1176_s24, 0 }
  0x4c   : > { %228 = sbr.rel (%p1183_p10) target bundleno = 542 (0x21e), region = 40  ;;  %s573_s14 = sshll.u32 (!%p1183_p10), %s1066_s13, 3 }
  0x4d   : > { %s231_s16 = scalar_lea.sflag (!%p1183_p10), [#allocation3], %s1066_s13  ;;  %s1072_s17 = scalar_lea.vmem (!%p1183_p10), [#allocation2], %s573_s14 }
  0x51   : > { %883 = dma.done.wait (%p1184_p4), %s231_s16, 128  }
  0x52   : > { %885 = vsyncadd (%p1184_p4), %s231_s16, 4294967168  ;;  %p1185_p8 = scmp.eq.s32.totalorder %s969_s22, 0 }
  0x54   : > { %887 = dma.done.wait (%p1185_p8), [#allocation6], 4096   ;;  %p1186_p3 = pmov %p1185_p8 }
  0x55   : > { %v915_v0 = vmov 0.0   ;;  %vm916_vm0 = vmmov 0   ;;  %v285_v1 = vld [vmem:[#allocation5 + $0x78] sm:$0xff]  ;;  %v284_v2 = vld [vmem:[#allocation5 + $0x70] sm:$0xff]  ;;  %v283_v3 = vld [vmem:[#allocation5 + $0x68] sm:$0xff]  ;;  %s580_s11 = sshll.u32 %s969_s22, 7 }
  0x56   : > { %889 = vsyncadd (%p1186_p3), [#allocation6], 4294963200  ;;  %617 = vmatprep.subr.mxu0 %v915_v0  ;;  %649 = vmatprep.mubr.msk.f32.mxu0 %vm916_vm0, %v915_v0  ;;  %v282_v4 = vld [vmem:[#allocation5 + $0x60] sm:$0xff]  ;;  %v383_v5 = vld [vmem:[#allocation7 + $0x78] sm:$0xff]  ;;  %s268_s12 = scalar_lea.vmem [#allocation8], %s573_s14  ;;  %s1129_s28 = scalar_lea.hbm %s1171_s5, %s580_s11 }
  0x57   : > { %652 = vmatprep.subr.mxu1 %v915_v0  ;;  %684 = vmatprep.mubr.msk.f32.mxu1 %vm916_vm0, %v915_v0  ;;  %v281_v6 = vld [vmem:[#allocation5 + $0x58] sm:$0xff]  ;;  %v382_v7 = vld [vmem:[#allocation7 + $0x70] sm:$0xff]  ;;  %v381_v8 = vld [vmem:[#allocation7 + $0x68] sm:$0xff]  ;;  %s476_s30 = sshll.u32 %s268_s12, 4  ;;  %s463_s7 = scalar_lea.sflag [#allocation4], %s1066_s13  ;;  %s477_s30 = int_to_ptr.vmem [resolvable:$true] %s476_s30 }
  0x58   : > { %618 = vmatpush3.msra.mxu0 %v285_v1  ;;  %653 = vmatpush3.msra.mxu1 %v383_v5  ;;  %v280_v9 = vld [vmem:[#allocation5 + $0x50] sm:$0xff]  ;;  %v380_v10 = vld [vmem:[#allocation7 + $0x60] sm:$0xff]  ;;  %v279_v11 = vld [vmem:[#allocation5 + $0x48] sm:$0xff]  ;;  %s840_s9 = scalar_lea.vmem %s477_s30, 128  ;;  %p1187_p0 = scmp.ne.s32.totalorder %s1181_s23, 0 }
  0x59   : > { %619 = vmatprep.subr.mxu0 %v915_v0  ;;  %654 = vmatprep.subr.mxu1 %v915_v0  ;;  %v278_v12 = vld [vmem:[#allocation5 + $0x40] sm:$0xff]  ;;  %v277_v13 = vld [vmem:[#allocation5 + $0x38] sm:$0xff]  ;;  %v276_v14 = vld [vmem:[#allocation5 + $0x30] sm:$0xff]  ;;  %p841_p11 = scmp.ne.s32.totalorder %s477_s30, %s840_s9  ;;  %s917_s22 = smov [#allocation8]  }
  0x5a   : > { %620 = vmatpush3.msra.mxu0 %v284_v2  ;;  %655 = vmatpush3.msra.mxu1 %v382_v7  ;;  %v275_v15 = vld [vmem:[#allocation5 + $0x28] sm:$0xff]  ;;  %v274_v16 = vld [vmem:[#allocation5 + $0x20] sm:$0xff]  ;;  %v273_v17 = vld [vmem:[#allocation5 + $0x18] sm:$0xff]  ;;  %s844_s16 = sshll.u32 %s917_s22, 4  ;;  %s845_s16 = int_to_ptr.vmem [resolvable:$false] %s844_s16 }
  0x5b   : > { %621 = vmatprep.subr.mxu0 %v915_v0  ;;  %656 = vmatprep.subr.mxu1 %v915_v0  ;;  %v272_v18 = vld [vmem:[#allocation5 + $0x10] sm:$0xff]  ;;  %v271_v19 = vld [vmem:[#allocation5 + $0x8] sm:$0xff]  ;;  %v270_v20 = vld [vmem:[#allocation5] sm:$0xff]  ;;  %p842_p1 = pnand %p841_p11, %p1187_p0  ;;  %s846_s14 = scalar_lea.vmem %s845_s16, 256 }
  0x5c   : > { %622 = vmatpush3.msra.mxu0 %v283_v3  ;;  %657 = vmatpush3.msra.mxu1 %v381_v8  ;;  %v269_v21 = vld [vmem:[%s1072_s17] sm:$0xff]  ;;  %v377_v24 = vld [vmem:[#allocation7 + $0x48] sm:$0xff]  ;;  %v376_v25 = vld [vmem:[#allocation7 + $0x40] sm:$0xff]  ;;  %p847_p6 = scmp.lt.s32.totalorder %s477_s30, %s845_s16  ;;  %p848_p12 = scmp.lt.s32.totalorder %s846_s14, %s840_s9 }
  0x5d   : > { %623 = vmatprep.subr.mxu0 %v915_v0  ;;  %658 = vmatprep.subr.mxu1 %v915_v0  ;;  %v379_v22 = vld [vmem:[#allocation7 + $0x58] sm:$0xff]  ;;  %v378_v23 = vld [vmem:[#allocation7 + $0x50] sm:$0xff]  ;;  %v373_v28 = vld [vmem:[#allocation7 + $0x28] sm:$0xff]  ;;  %p843_p2 = pneg %p842_p1 }
  0x5e   : > { %624 = vmatpush3.msra.mxu0 %v282_v4  ;;  %659 = vmatpush3.msra.mxu1 %v380_v10  ;;  %v375_v26 = vld [vmem:[#allocation7 + $0x38] sm:$0xff]  ;;  %v374_v27 = vld [vmem:[#allocation7 + $0x30] sm:$0xff]  ;;  %v372_v29 = vld [vmem:[#allocation7 + $0x20] sm:$0xff]  ;;  %p849_p7 = por %p848_p12, %p847_p6 }
  0x5f   : > { %625 = vmatprep.subr.mxu0 %v915_v0  ;;  %660 = vmatprep.subr.mxu1 %v915_v0  ;;  %v371_v30 = vld [vmem:[#allocation7 + $0x18] sm:$0xff]  ;;  %v370_v31 = vld [vmem:[#allocation7 + $0x10] sm:$0xff]  ;;  %v369_v32 = vld [vmem:[#allocation7 + $0x8] sm:$0xff] }
  0x60   : > { %626 = vmatpush3.msra.mxu0 %v281_v6  ;;  %661 = vmatpush3.msra.mxu1 %v379_v22  ;;  %v368_v33 = vld [vmem:[#allocation7] sm:$0xff]  ;;  %v577_v34 = vld [vmem:[%s1168_s2] ss:$0 sm:$0xff]  ;;  %p850_p9 = pnand %p849_p7, %p843_p2 }
  0x61   : > { %627 = vmatprep.subr.mxu0 %v915_v0  ;;  %662 = vmatprep.subr.mxu1 %v915_v0  ;;  %v578_v43 = vld [vmem:[%s1170_s4] ss:$0 sm:$0xff] }
  0x62   : > { %628 = vmatpush3.msra.mxu0 %v280_v9  ;;  %663 = vmatpush3.msra.mxu1 %v378_v23 }
  0x63   : > { %629 = vmatprep.subr.mxu0 %v915_v0  ;;  %664 = vmatprep.subr.mxu1 %v915_v0 }
  0x64   : > { %630 = vmatpush3.msra.mxu0 %v279_v11  ;;  %665 = vmatpush3.msra.mxu1 %v377_v24 }
  0x65   : > { %631 = vmatprep.subr.mxu0 %v915_v0  ;;  %666 = vmatprep.subr.mxu1 %v915_v0 }
  0x66   : > { %632 = vmatpush3.msra.mxu0 %v278_v12  ;;  %667 = vmatpush3.msra.mxu1 %v376_v25 }
  0x67   : > { %633 = vmatprep.subr.mxu0 %v915_v0  ;;  %668 = vmatprep.subr.mxu1 %v915_v0 }
  0x68   : > { %634 = vmatpush3.msra.mxu0 %v277_v13  ;;  %669 = vmatpush3.msra.mxu1 %v375_v26 }
  0x69   : > { %635 = vmatprep.subr.mxu0 %v915_v0  ;;  %670 = vmatprep.subr.mxu1 %v915_v0 }
  0x6a   : > { %636 = vmatpush3.msra.mxu0 %v276_v14  ;;  %671 = vmatpush3.msra.mxu1 %v374_v27 }
  0x6b   : > { %637 = vmatprep.subr.mxu0 %v915_v0  ;;  %672 = vmatprep.subr.mxu1 %v915_v0 }
  0x6c   : > { %638 = vmatpush3.msra.mxu0 %v275_v15  ;;  %673 = vmatpush3.msra.mxu1 %v373_v28 }
  0x6d   : > { %639 = vmatprep.subr.mxu0 %v915_v0  ;;  %674 = vmatprep.subr.mxu1 %v915_v0 }
  0x6e   : > { %640 = vmatpush3.msra.mxu0 %v274_v16  ;;  %675 = vmatpush3.msra.mxu1 %v372_v29 }
  0x6f   : > { %641 = vmatprep.subr.mxu0 %v915_v0  ;;  %676 = vmatprep.subr.mxu1 %v915_v0 }
  0x70   : > { %642 = vmatpush3.msra.mxu0 %v273_v17  ;;  %677 = vmatpush3.msra.mxu1 %v371_v30 }
  0x71   : > { %643 = vmatprep.subr.mxu0 %v915_v0  ;;  %678 = vmatprep.subr.mxu1 %v915_v0 }
  0x72   : > { %644 = vmatpush3.msra.mxu0 %v272_v18  ;;  %679 = vmatpush3.msra.mxu1 %v370_v31 }
  0x73   : > { %645 = vmatprep.subr.mxu0 %v915_v0  ;;  %680 = vmatprep.subr.mxu1 %v915_v0 }
  0x74   : > { %646 = vmatpush3.msra.mxu0 %v271_v19  ;;  %681 = vmatpush3.msra.mxu1 %v369_v32 }
  0x75   : > { %647 = vmatprep.subr.mxu0 %v915_v0  ;;  %682 = vmatprep.subr.mxu1 %v915_v0 }
  0x76   : > { %648 = vmatpush3.msra.mxu0 %v270_v20  ;;  %683 = vmatpush3.msra.mxu1 %v368_v33 }
  0x77   : > { %650 = vmatmul.mubr.f32.vlgmr.msra.gmra.mxu0 %v269_v21 }
 0x137   : > { %v359_v35 = vpop.f32.mrf.mxu0 }
 0x138   : > { %v360_v36 = vadd.f32 %v577_v34, %v359_v35 }
 0x139   : > { %v651_v37 = vpop.f32.mrf.mxu0 }
 0x13a   : > { %v364_v38 = vmul.f32 0.70710677, %v360_v36  ;;  %v363_v40 = vmul.f32 0.5, %v360_v36 }
 0x13c   : > { %758 = verf.f32 %v364_v38 }
 0x149   : > { %v759_v39 = vpop.eup %758 }
 0x14a   : > { %v366_v41 = vadd.f32 1.0, %v759_v39 }
 0x14c   : > { %v367_v42 = vmul.f32 %v366_v41, %v363_v40 }
 0x14e   : > { %685 = vmatmul.mubr.f32.vlgmr.msra.gmra.mxu1 %v367_v42 }
 0x20e   : > { %v457_v44 = vpop.f32.mrf.mxu1 }
 0x20f   : > { %v458_v45 = vadd.f32 %v578_v43, %v457_v44 }
 0x210   : > { %v686_v46 = vpop.f32.mrf.mxu1 }
 0x211   : > { %461 = vst [vmem:[%s268_s12] sm:$0xff] %v458_v45 }
 0x212   : > { %853 = shalt.err (!%p850_p9)
}
 0x213   : > { %s854_s17 = scalar_lea.hbm %s1129_s28, 128  ;;  %s858_s26 = scalar_lea.hbm %s1171_s5, 256 }
 0x214   : > { %p855_p13 = scmp.ne.s32.totalorder %s1129_s28, %s854_s17  ;;  %p859_p4 = scmp.lt.s32.totalorder %s1129_s28, %s1171_s5 }
 0x215   : > { %p860_p8 = scmp.lt.s32.totalorder %s858_s26, %s854_s17 }
 0x216   : > { %p856_p5 = pnand %p855_p13, %p1187_p0 }
 0x217   : > { %p861_p3 = por %p860_p8, %p859_p4 }
 0x218   : > { %p857_p10 = pneg %p856_p5 }
 0x21a   : > { %p862_p11 = pnand %p861_p3, %p857_p10 }
 0x21c   : > { %865 = shalt.err (!%p862_p11)
}
 0x21d   : > { %697 = dma.vmem_to_hbm [thread:$0]  (%p1187_p0), %s477_s30, 128, %s1129_s28, %s463_s7  }
 0x21e PF: > { %s488_s11 = sand.u32 1, %s896_s18   ;;  %p1188_p1 = scmp.ne.s32.totalorder %s1177_s25, 0 }
 0x21f   : > { %p1189_p2 = scmp.ge.s32.totalorder %s908_s21, 2  ;;  %s489_s12 = scalar_lea.sflag [#allocation4], %s488_s11 }
 0x221   : > { %p711_p6 = pnand %p1189_p2, %p1188_p1 }
 0x223   : > { %p712_p12 = pneg %p711_p6 }
 0x225   : > { %891 = dma.done.wait (%p712_p12), %s489_s12, 128  }
 0x226   : > { %893 = vsyncadd (%p712_p12), %s489_s12, 4294967168  ;;  %p19_p7 = scmp.ge.s32.totalorder %s1020_s15, 4   ;;  %s1190_s18 = smov %s900_s19 }
 0x227   : > { %s1191_s19 = smov %s904_s20  ;;  %s1192_s20 = smov %s1036_s27 }
 0x228   : > { %s1193_s21 = smov %s1020_s15  ;;  %21 = sbr.rel (!%p19_p7) target bundleno = 6 (0x6), region = 93 }
 0x22d   :  { %494 = vsyncpa [#allocation3], 1 }
 0x22e   :  { %496 = vsyncpa [#allocation3 + $0x1], 1 }
 0x22f   :  { %497 = vsyncpa [#allocation6], 1 }
 0x230   :  { %498 = vsyncpa [#allocation4], 1 }
 0x231   :  { %500 = vsyncpa [#allocation4 + $0x1], 1 }

</bundles_post_ra>
